<compile_context>
chip_gen: v7x
topology: tpu7x:2x2x1
jax: 0.10.0
libtpu: 0.0.40
codegen_flags: <defaults>
</compile_context>

<pallas_src>
import numpy as np
import jax
import jax.numpy as jnp
from jax.experimental import pallas as pl
from jax.experimental.pallas import tpu as pltpu

# ----------------------- config (mirrors the module's hidden-dim rule) -----------------------
B, S, D = 2, 8, 32
MULTIPLE_OF = 32
_hd = int(2 * (4 * D) / 3)                                           # int(2*hidden_dim/3), hidden_dim=4*D
FFN_DIM = MULTIPLE_OF * ((_hd + MULTIPLE_OF - 1) // MULTIPLE_OF)     # 96
FFN_PAD = 128          # hidden dim zero-padded 96 -> 128 for a lane-aligned gate/up split
BS = B * S
DTYPE = jnp.float32


# ----------------------- kernel -----------------------
def ffn_kernel(x_ref, w13_ref, w2_ref, out_ref):
    x = x_ref[...]                                                    # (BS, D) f32
    # Fused gate/up projection on the MXU: bf16 inputs, f32 accumulation.
    h = jnp.dot(x.astype(jnp.bfloat16), w13_ref[...],
                preferred_element_type=jnp.float32)                   # (BS, 2*FFN_PAD) f32
    g = h[:, :FFN_PAD]            # gate  (slice at a lane-aligned 128 boundary)
    u = h[:, FFN_PAD:]            # up
    # Element-wise work stays in f32 (v5e VPU/EUP have no bf16 support).
    f = jax.nn.silu(g) * u                                            # (BS, FFN_PAD) f32
    # Down projection: cast the activation to bf16 only at the MXU boundary.
    out_ref[...] = jnp.dot(f.astype(jnp.bfloat16), w2_ref[...],
                           preferred_element_type=jnp.float32).astype(out_ref.dtype)


# ----------------------- one-time weight packing (load time, NOT per forward) -----------------------
def pack_ffn_weights(w1, w2, w3):
    """Fuse/pad the three FFN weights once.

    Returns:
      w13: (D, 2*FFN_PAD) bf16 — [w1 | w3], hidden dim zero-padded 96 -> 128.
      w2p: (FFN_PAD, D)   bf16 — w2 with zero-padded rows (contribute exactly 0).
    """
    w1p = jnp.pad(w1, ((0, 0), (0, FFN_PAD - FFN_DIM)))
    w3p = jnp.pad(w3, ((0, 0), (0, FFN_PAD - FFN_DIM)))
    w13 = jnp.concatenate([w1p, w3p], axis=1).astype(jnp.bfloat16)    # (D, 2*FFN_PAD)
    w2p = jnp.pad(w2, ((0, FFN_PAD - FFN_DIM), (0, 0))).astype(jnp.bfloat16)  # (FFN_PAD, D)
    return w13, w2p


# ----------------------- forward -----------------------
def feed_forward(x, w13, w2p):
    """x: (B, S, D) f32; w13/w2p: pre-packed bf16 weights from pack_ffn_weights."""
    b, s, d = x.shape
    x2d = x.reshape(b * s, d)

    out = pl.pallas_call(
        ffn_kernel,
        out_shape=jax.ShapeDtypeStruct((b * s, d), x.dtype),
        # No grid: single invocation, whole arrays resident in VMEM, no pipeline buffers.
        in_specs=[
            pl.BlockSpec(memory_space=pltpu.MemorySpace.VMEM),
            pl.BlockSpec(memory_space=pltpu.MemorySpace.VMEM),
            pl.BlockSpec(memory_space=pltpu.MemorySpace.VMEM),
        ],
        out_specs=pl.BlockSpec(memory_space=pltpu.MemorySpace.VMEM),
    )(x2d, w13, w2p)

    return out.reshape(b, s, d)


feed_forward_jit = jax.jit(feed_forward)


# ----------------------- pure-JAX reference (mirrors the PyTorch forward) -----------------------
def reference_ffn(x, w1, w2, w3):
    return (jax.nn.silu(x @ w1) * (x @ w3)) @ w2


# ----------------------- setup / check -----------------------
if __name__ == "__main__":
    key = jax.random.PRNGKey(0)
    kx, k1, k2, k3 = jax.random.split(key, 4)
    scale = 0.05
    x = jax.random.normal(kx, (B, S, D), DTYPE)
    w1 = scale * jax.random.normal(k1, (D, FFN_DIM), DTYPE)   # stored transposed: x @ w1
    w2 = scale * jax.random.normal(k2, (FFN_DIM, D), DTYPE)
    w3 = scale * jax.random.normal(k3, (D, FFN_DIM), DTYPE)

    # Pack once at "weight-load" time (not inside the forward path).
    w13, w2p = pack_ffn_weights(w1, w2, w3)
    w13, w2p = jax.block_until_ready((w13, w2p))

    out = feed_forward_jit(x, w13, w2p)
    out = jax.block_until_ready(out)

    ref = reference_ffn(x, w1, w2, w3)
    np_out = np.asarray(out)
    np_ref = np.asarray(ref)
    assert np_out.shape == (B, S, D)
    # Tolerance loosened vs. the pure-f32 version: MXU inputs are bf16 (f32 accumulation).
    assert np.allclose(np_out, np_ref, rtol=2e-2, atol=2e-3), (
        f"max abs err {np.max(np.abs(np_out - np_ref))}")

    print("KERNEL_OK")
</pallas_src>

<mosaic_0001>
module attributes {stable_mosaic.version = 11 : i64} {
  func.func @ffn_kernel(%arg0: memref<16x32xf32, #tpu.memory_space<vmem>>, %arg1: memref<32x256xbf16, #tpu.memory_space<vmem>>, %arg2: memref<128x32xbf16, #tpu.memory_space<vmem>>, %arg3: memref<16x32xf32, #tpu.memory_space<vmem>>) attributes {dimension_semantics = [], scalar_prefetch = 0 : i64, scratch_operands = 0 : i64, tpu.core_type = #tpu.core_type<tc>} {
    %c0 = arith.constant 0 : index
    %c0_0 = arith.constant 0 : index
    %0 = vector.load %arg0[%c0, %c0_0] : memref<16x32xf32, #tpu.memory_space<vmem>>, vector<16x32xf32>
    %1 = arith.truncf %0 : vector<16x32xf32> to vector<16x32xbf16>
    %c0_1 = arith.constant 0 : index
    %c0_2 = arith.constant 0 : index
    %2 = vector.load %arg1[%c0_1, %c0_2] : memref<32x256xbf16, #tpu.memory_space<vmem>>, vector<32x256xbf16>
    %cst = arith.constant dense<0.000000e+00> : vector<16x256xf32>
    %3 = tpu.matmul %1, %2, %cst {dimension_numbers = #tpu.dot_dimension_numbers<[1], [0], [0], [1], [0, 0, 1, 1], [], []>} : vector<16x32xbf16>, vector<32x256xbf16>, vector<16x256xf32> -> vector<16x256xf32>
    %4 = vector.extract_strided_slice %3 {offsets = [0, 0], sizes = [16, 128], strides = [1, 1]} : vector<16x256xf32> to vector<16x128xf32>
    %5 = vector.extract_strided_slice %3 {offsets = [0, 128], sizes = [16, 128], strides = [1, 1]} : vector<16x256xf32> to vector<16x128xf32>
    %6 = arith.negf %4 : vector<16x128xf32>
    %7 = math.exp %6 : vector<16x128xf32>
    %cst_3 = arith.constant 1.000000e+00 : f32
    %8 = vector.broadcast %cst_3 : f32 to vector<16x128xf32>
    %9 = arith.addf %8, %7 : vector<16x128xf32>
    %10 = arith.divf %8, %9 : vector<16x128xf32>
    %11 = arith.mulf %4, %10 : vector<16x128xf32>
    %12 = arith.mulf %11, %5 : vector<16x128xf32>
    %13 = arith.truncf %12 : vector<16x128xf32> to vector<16x128xbf16>
    %c0_4 = arith.constant 0 : index
    %c0_5 = arith.constant 0 : index
    %14 = vector.load %arg2[%c0_4, %c0_5] : memref<128x32xbf16, #tpu.memory_space<vmem>>, vector<128x32xbf16>
    %cst_6 = arith.constant dense<0.000000e+00> : vector<16x32xf32>
    %15 = tpu.matmul %13, %14, %cst_6 {dimension_numbers = #tpu.dot_dimension_numbers<[1], [0], [0], [1], [0, 0, 1, 1], [], []>} : vector<16x128xbf16>, vector<128x32xbf16>, vector<16x32xf32> -> vector<16x32xf32>
    %c0_7 = arith.constant 0 : index
    %c0_8 = arith.constant 0 : index
    %16 = vector.load %arg3[%c0_7, %c0_8] : memref<16x32xf32, #tpu.memory_space<vmem>>, vector<16x32xf32>
    tpu.vector_store %arg3[%c0_7, %c0_8], %15 {strides = array<i32>} : memref<16x32xf32, #tpu.memory_space<vmem>>, vector<16x32xf32>,
    return
  }
}

</mosaic_0001>

<bundles_post_ra>
// kernel: feed_forward.1
= control target key start
LH: loop header
LB: loop body
LE: loop exit
PB: predicated region body
PF: predicated region fallthrough
CT: control target
= control target key end

     0   :  { %v326_v2 = vmov 0   ;;  %vm43_vm0 = vcmask 261120   ;;  %s409_s0 = inlined_call_operand.vmem [shape: f32[16,32], index: 0, kind: input, shape index: {}]   ;;  %s410_s1 = inlined_call_operand.vmem [shape: bf16[32,256], index: 1, kind: input, shape index: {}]   ;;  %s411_s2 = inlined_call_operand.vmem [shape: bf16[128,32], index: 2, kind: input, shape index: {}]   ;;  %s412_s3 = inlined_call_operand.hbm [shape: f32[16,32], index: 3, kind: output, shape index: {}]  }
   0x1   :  { %v280_v0 = vld [vmem:[%s410_s1 + $0x4] ss:$8 sps:$4 sm:$0xff]   ;;  %v282_v1 = vld [vmem:[%s410_s1] ss:$8 sps:$4 sm:$0xff]   ;;  %79 = vmatprep.mubr.bf16.mxu0 %v326_v2  ;;  %v283_v3 = vld [vmem:[%s410_s1 + $0x14] ss:$8 sps:$4 sm:$0xff]  }
   0x2   :  { %47 = vmatprep.subr.bf16.mxu0 %v280_v0  ;;  %v285_v4 = vld [vmem:[%s410_s1 + $0x10] ss:$8 sps:$4 sm:$0xff]   ;;  %v16_v5 = vld [vmem:[%s409_s0] sm:$0xff]  ;;  %v17_v6 = vld [vmem:[%s409_s0 + $0x8] sm:$0xff] }
   0x3   :  { %48 = vmatpush1.bf16.msra.mxu0 %v282_v1  ;;  %v18_v7 = vpack.c.bf16 %v17_v6, %v16_v5 }
   0x4   :  { %49 = vmatprep.subr.bf16.mxu0 %v283_v3 }
   0x7   :  { %50 = vmatpush1.bf16.msra.mxu0 %v285_v4 }
   0x8   :  { %8 = vsyncpa [#allocation3], 0  ;;  %v286_v8 = vld [vmem:[%s411_s2] sm:$0xff]   ;;  %v327_v9 = vmov 0.0   ;;  %v287_v10 = vld [vmem:[%s411_s2 + $0x8] sm:$0xff]   ;;  %vm328_vm1 = vmmov 0  }
   0x9   :  { %254 = vmatprep.subr.bf16.mxu1 %v327_v9  ;;  %v288_v11 = vld [vmem:[%s411_s2 + $0x10] sm:$0xff]   ;;  %v289_v12 = vld [vmem:[%s411_s2 + $0x18] sm:$0xff]   ;;  %v290_v13 = vld [vmem:[%s411_s2 + $0x20] sm:$0xff]   ;;  %270 = vmatprep.mubr.msk.bf16.mxu1 %vm328_vm1, %v327_v9 }
   0xa   :  { %234 = vmatmul.mubr.msk.bf16.vlgmr.msra.gmra.mrb[0].mxu0 %vm43_vm0, %v18_v7  ;;  %255 = vmatpush3.bf16.msra.mxu1 %v286_v8  ;;  %v291_v14 = vld [vmem:[%s411_s2 + $0x28] sm:$0xff]   ;;  %v292_v15 = vld [vmem:[%s411_s2 + $0x30] sm:$0xff]   ;;  %v293_v16 = vld [vmem:[%s411_s2 + $0x38] sm:$0xff]   ;;  %s329_s2 = smov [#allocation2]  }
   0xb   :  { %256 = vmatprep.subr.bf16.mxu1 %v327_v9  ;;  %s219_s11 = sshll.u32 %s329_s2, 4  ;;  %s220_s11 = int_to_ptr.vmem [resolvable:$true] %s219_s11 }
   0xc   :  { %s302_s12 = scalar_lea.vmem %s220_s11, 256  ;;  %p307_p1 = scmp.lt.s32.totalorder %s220_s11, %s220_s11 }
   0xd   :  { %p303_p0 = scmp.ne.s32.totalorder %s220_s11, %s302_s12  ;;  %p308_p2 = scmp.lt.s32.totalorder %s302_s12, %s302_s12 }
   0xe   :  { %257 = vmatpush3.bf16.msra.mxu1 %v287_v10 }
   0xf   :  { %258 = vmatprep.subr.bf16.mxu1 %v327_v9  ;;  %p309_p3 = por %p308_p2, %p307_p1 }
  0x11   :  { %p310_p4 = pnand %p309_p3, %p303_p0 }
  0x12   :  { %259 = vmatpush3.bf16.msra.mxu1 %v288_v11 }
  0x13   :  { %260 = vmatprep.subr.bf16.mxu1 %v327_v9 }
  0x16   :  { %261 = vmatpush3.bf16.msra.mxu1 %v289_v12 }
  0x17   :  { %262 = vmatprep.subr.bf16.mxu1 %v327_v9 }
  0x1a   :  { %263 = vmatpush3.bf16.msra.mxu1 %v290_v13 }
  0x1b   :  { %264 = vmatprep.subr.bf16.mxu1 %v327_v9 }
  0x1e   :  { %265 = vmatpush3.bf16.msra.mxu1 %v291_v14 }
  0x1f   :  { %266 = vmatprep.subr.bf16.mxu1 %v327_v9 }
  0x22   :  { %267 = vmatpush3.bf16.msra.mxu1 %v292_v15 }
  0x23   :  { %268 = vmatprep.subr.bf16.mxu1 %v327_v9 }
  0x26   :  { %269 = vmatpush3.bf16.msra.mxu1 %v293_v16 }
  0xdd   :  { %v81_v17 = vpop.f32.mrb[0].mxu0 }
  0xde   :  { %v235_v18 = vmul.f32 -1.442695, %v81_v17  ;;  %v83_v19 = vpop.f32.mrb[1].mxu0 }
  0xdf   :  { %v85_v20 = vpop.f32.mrb[2].mxu0 }
  0xe0   :  { %294 = vpow2.f32 %v235_v18  ;;  %v236_v21 = vmul.f32 -1.442695, %v85_v20  ;;  %v87_v22 = vpop.f32.mrb[3].mxu0 }
  0xe2   :  { %296 = vpow2.f32 %v236_v21 }
  0xea   :  { %v295_v23 = vpop.eup %294 }
  0xeb   :  { %v96_v24 = vadd.f32 1.0, %v295_v23 }
  0xec   :  { %v297_v25 = vpop.eup %296 }
  0xed   :  { %298 = vrcp.f32 %v96_v24  ;;  %v97_v26 = vadd.f32 1.0, %v297_v25 }
  0xef   :  { %300 = vrcp.f32 %v97_v26 }
  0xf7   :  { %v299_v27 = vpop.eup %298 }
  0xf8   :  { %v102_v28 = vmul.f32 %v299_v27, %v81_v17 }
  0xf9   :  { %v301_v29 = vpop.eup %300 }
  0xfa   :  { %v104_v30 = vmul.f32 %v102_v28, %v83_v19  ;;  %v103_v31 = vmul.f32 %v301_v29, %v85_v20 }
  0xfc   :  { %v105_v32 = vmul.f32 %v103_v31, %v87_v22 }
  0xfe   :  { %v106_v33 = vpack.c.bf16 %v105_v32, %v104_v30 }
 0x100   :  { %271 = vmatmul.mubr.bf16.vlgmr.msra.gmra.mrb[0].mxu1 %v106_v33 }
 0x1d3   :  { %v205_v34 = vpop.f32.mrb[0].mxu1 }
 0x1d4   :  { %212 = vst.msk [vmem:[#allocation2] sm:$0xff] %vm43_vm0, %v205_v34  ;;  %v272_v35 = vpop.f32.mrb[1].mxu1 }
 0x1d5   :  { %v208_v36 = vpop.f32.mrb[2].mxu1 }
 0x1d6   :  { %213 = vst.msk [vmem:[#allocation2 + $0x8] sm:$0xff] %vm43_vm0, %v208_v36  ;;  %v273_v37 = vpop.f32.mrb[3].mxu1 }
 0x1d7   :  { %313 = shalt.err (!%p310_p4)
}
 0x1d8   :  { %s314_s15 = scalar_lea.hbm %s412_s3, 256 }
 0x1d9   :  { %p315_p5 = scmp.ne.s32.totalorder %s412_s3, %s314_s15  ;;  %p318_p6 = scmp.lt.u32.totalorder %s314_s15, %s412_s3 }
 0x1db   :  { %p320_p7 = pnand %p318_p6, %p315_p5 }
 0x1dd   :  { %323 = shalt.err (!%p320_p7)
}
 0x1de   :  { %s330_s20 = smov 128   ;;  %s331_s21 = smov 8  }
 0x1df   :  { %225 = dma.vmem_to_hbm [thread:$0]  %s220_s11, 256, %s412_s3, [#allocation3], %s330_s20, %s330_s20, %s331_s21  }
 0x1e0   :  { %324 = dma.done.wait [#allocation3], 256  }
 0x1e1   :  { %325 = vsyncadd [#allocation3], 4294967040 }
 0x1e2   :  { %229 = vsyncpa [#allocation3], 1 }

</bundles_post_ra>
